<compile_context>
chip_gen: v7x
topology: tpu7x:2x2x1
jax: 0.10.0
libtpu: 0.0.40
codegen_flags: <defaults>
</compile_context>

<pallas_src>
import functools

import numpy as np
import jax
import jax.numpy as jnp
from jax.experimental import pallas as pl
from jax.experimental.pallas import tpu as pltpu


def cbam_kernel(x_ref, w1_ref, w2_ref, tapmask_ref, bias_ref, o_ref, *, W):
    Bt, C, HW = x_ref.shape

    # ---- Channel attention: global avg pool -> FC -> ReLU -> FC -> sigmoid.
    pooled = jnp.mean(x_ref[...].astype(jnp.float32), axis=2)            # (Bt, C)
    h = jnp.maximum(
        jnp.dot(pooled, w1_ref[...], preferred_element_type=jnp.float32,
                precision=jax.lax.Precision.HIGHEST), 0.0)               # (Bt, Cr)
    s = jax.nn.sigmoid(
        jnp.dot(h, w2_ref[...], preferred_element_type=jnp.float32,
                precision=jax.lax.Precision.HIGHEST))                    # (Bt, C)

    # ---- Channel-gated tensor (VPU, exact f32).  Reused for the output store.
    xg = x_ref[...].astype(jnp.float32) * s[:, :, None]                  # (Bt, C, HW)

    # ---- Channel-mean of the gated tensor (input of Spatial_Attention; both
    # branches of the reference are the mean, so the 2-channel concat collapses).
    mean_c = jnp.sum(xg, axis=1) * (1.0 / C)                             # (Bt, HW)

    # ---- 3x3 SAME conv on the flattened HW axis as 9 XLU lane-rolls.
    # NOTE: this is only correct because every wrap-around read coincides with a
    # tap whose static zero-padding validity mask (pre-folded into tapmask_ref)
    # is zero there.  Do not change padding mode / stride without revisiting.
    tapmask = tapmask_ref[...]                                           # (9, HW)
    acc = jnp.zeros((Bt, HW), jnp.float32)
    for ky in range(3):
        for kx in range(3):
            d = (ky - 1) * W + (kx - 1)
            shifted = mean_c if d == 0 else pltpu.roll(
                mean_c, shift=(-d) % HW, axis=1)                         # XLU rotate
            t = ky * 3 + kx
            acc = acc + tapmask[t:t + 1, :] * shifted
    sa = jax.nn.sigmoid(acc + bias_ref[0])                               # (Bt, HW)

    # ---- Fused output: (x * channel_gate) * spatial_gate.
    o_ref[...] = (xg * sa[:, None, :]).astype(o_ref.dtype)


def cbam_block(x, w1, w2, conv_w, conv_b, *, bt=None,
               vmem_budget_bytes=24 * 1024 * 1024):
    B, C, H, W = x.shape
    Cr = w1.shape[0]
    HW = H * W
    itemsize = x.dtype.itemsize

    # Lane-dense view of the NCHW tensor (free reshape for contiguous input).
    x3 = x.reshape(B, C, HW)

    # FC weights pre-transposed: kernel does (Bt,C)@(C,Cr) then (Bt,Cr)@(Cr,C).
    w1_t = jnp.asarray(w1, jnp.float32).T                                # (C, Cr)
    w2_t = jnp.asarray(w2, jnp.float32).T                                # (Cr, C)

    # Both spatial-attention branches are the channel mean (reference "max" is
    # also a mean), so the 2-in-channel conv collapses: sum taps over input
    # channels, then fold in the static zero-padding validity mask per tap.
    taps = (conv_w[0, 0] + conv_w[0, 1]).reshape(9).astype(jnp.float32)  # (9,)
    masks = np.zeros((9, H, W), np.float32)
    for ky in range(3):
        for kx in range(3):
            dy, dx = ky - 1, kx - 1
            m = np.zeros((H, W), np.float32)
            m[max(0, -dy):H - max(0, dy), max(0, -dx):W - max(0, dx)] = 1.0
            masks[ky * 3 + kx] = m
    tapmask = taps[:, None] * jnp.asarray(masks.reshape(9, HW))          # (9, HW)
    bias = conv_b.astype(jnp.float32).reshape(1)                         # (1,)

    # Batch elements per grid step:
    #   per_elem = double-buffered in + out windows (4 * itemsize * C * HW)
    #              + ~2 block-sized f32 in-kernel temporaries (xg + fused out).
    #   cap bt at B // 2 so the grid has >= 2 steps (v7x: 2 TCs share the
    #   "parallel" axis; costs nothing on single-TC v5e/v6e).
    if bt is None:
        per_elem = C * HW * (4 * itemsize + 2 * 4)
        cap = max(1, vmem_budget_bytes // max(per_elem, 1))
        cap = min(cap, max(1, B // 2))
        bt = int(min(cap, B))

    # Robust to B not divisible by bt: pad the batch, slice the result.
    n_steps = pl.cdiv(B, bt)
    Bp = n_steps * bt
    if Bp != B:
        x3 = jnp.pad(x3, ((0, Bp - B), (0, 0), (0, 0)))

    cost = pl.CostEstimate(
        flops=5 * Bp * C * HW + 18 * Bp * HW + 4 * Bp * C * Cr,
        transcendentals=Bp * (C + HW),
        bytes_accessed=2 * Bp * C * HW * itemsize + (2 * C * Cr + 9 * HW) * 4,
    )

    out3 = pl.pallas_call(
        functools.partial(cbam_kernel, W=W),
        out_shape=jax.ShapeDtypeStruct((Bp, C, HW), x.dtype),
        grid_spec=pltpu.PrefetchScalarGridSpec(
            num_scalar_prefetch=0,
            grid=(n_steps,),
            in_specs=[
                pl.BlockSpec((bt, C, HW), lambda i: (i, 0, 0)),
                pl.BlockSpec((C, Cr), lambda i: (0, 0)),
                pl.BlockSpec((Cr, C), lambda i: (0, 0)),
                pl.BlockSpec((9, HW), lambda i: (0, 0)),
                pl.BlockSpec(memory_space=pltpu.MemorySpace.SMEM),
            ],
            out_specs=pl.BlockSpec((bt, C, HW), lambda i: (i, 0, 0)),
        ),
        compiler_params=pltpu.CompilerParams(
            dimension_semantics=("parallel",),
            vmem_limit_bytes=min(int(vmem_budget_bytes * 3 // 2),
                                 48 * 1024 * 1024),
        ),
        cost_estimate=cost,
    )(x3, w1_t, w2_t, tapmask, bias)

    if Bp != B:
        out3 = out3[:B]
    return out3.reshape(B, C, H, W)


def cbam_ref(x, w1, w2, conv_w, conv_b):
    """Pure-JAX reference (mirrors the PyTorch forward exactly)."""
    pooled = jnp.mean(x, axis=(2, 3))                      # (B, C)
    h = jax.nn.relu(pooled @ w1.T)
    s = jax.nn.sigmoid(h @ w2.T)                           # (B, C)
    x_ca = x * s[:, :, None, None]
    m = jnp.mean(x_ca, axis=1, keepdims=True)              # (B, 1, H, W)
    y = jnp.concatenate([m, m], axis=1)                    # (B, 2, H, W)  (reference "max" bug kept)
    y = jax.lax.conv_general_dilated(
        y, conv_w, window_strides=(1, 1), padding="SAME",
        dimension_numbers=("NCHW", "OIHW", "NCHW")) + conv_b.reshape(1, 1, 1, 1)
    return x_ca * jax.nn.sigmoid(y)


if __name__ == "__main__":
    # channel must be >= reduction(16) for the PyTorch module to be valid
    B, C, H, W = 2, 32, 16, 16
    Cr = C // 16

    key = jax.random.PRNGKey(0)
    kx, k1, k2, k3, k4 = jax.random.split(key, 5)
    x = jax.random.normal(kx, (B, C, H, W), dtype=jnp.float32)
    w1 = 0.1 * jax.random.normal(k1, (Cr, C), dtype=jnp.float32)       # Linear(C, C//16, bias=False)
    w2 = 0.1 * jax.random.normal(k2, (C, Cr), dtype=jnp.float32)       # Linear(C//16, C, bias=False)
    conv_w = 0.1 * jax.random.normal(k3, (1, 2, 3, 3), dtype=jnp.float32)  # Conv2d(2, 1, 3, padding=1)
    conv_b = 0.1 * jax.random.normal(k4, (1,), dtype=jnp.float32)

    out = cbam_block(x, w1, w2, conv_w, conv_b)
    out = jax.block_until_ready(out)

    ref = cbam_ref(x, w1, w2, conv_w, conv_b)
    err = float(jnp.max(jnp.abs(out - ref)))
    assert err < 1e-3, f"mismatch vs reference: max abs err {err}"

    print("KERNEL_OK")
</pallas_src>

<mosaic_0001>
module attributes {stable_mosaic.version = 11 : i64} {
  func.func @cbam_kernel(%arg0: i32, %arg1: memref<1x32x256xf32, #tpu.memory_space<vmem>>, %arg2: memref<32x2xf32, #tpu.memory_space<vmem>>, %arg3: memref<2x32xf32, #tpu.memory_space<vmem>>, %arg4: memref<9x256xf32, #tpu.memory_space<vmem>>, %arg5: memref<1xf32, #tpu.memory_space<smem>>, %arg6: memref<1x32x256xf32, #tpu.memory_space<vmem>>) attributes {dimension_semantics = [#tpu.dimension_semantics<parallel>], iteration_bounds = array<i64: 2>, scalar_prefetch = 0 : i64, scratch_operands = 0 : i64, tpu.core_type = #tpu.core_type<tc>, window_params = [{transform_indices = @transform_0, window_bounds = array<i64: 1, 32, 256>}, {pipeline_mode = #tpu.pipeline_mode<synchronous>, transform_indices = @transform_1, window_bounds = array<i64: 32, 2>}, {pipeline_mode = #tpu.pipeline_mode<synchronous>, transform_indices = @transform_2, window_bounds = array<i64: 2, 32>}, {pipeline_mode = #tpu.pipeline_mode<synchronous>, transform_indices = @transform_3, window_bounds = array<i64: 9, 256>}, {transform_indices = @transform_4, window_bounds = array<i64: 1>}, {transform_indices = @transform_5, window_bounds = array<i64: 1, 32, 256>}]} {
    %c0 = arith.constant 0 : index
    %c0_0 = arith.constant 0 : index
    %c0_1 = arith.constant 0 : index
    %0 = vector.load %arg1[%c0, %c0_0, %c0_1] : memref<1x32x256xf32, #tpu.memory_space<vmem>>, vector<1x32x256xf32>
    %cst = arith.constant dense<0.000000e+00> : vector<1x32xf32>
    %1 = vector.multi_reduction <add>, %0, %cst [2] : vector<1x32x256xf32> to vector<1x32xf32>
    %cst_2 = arith.constant 2.560000e+02 : f32
    %2 = vector.broadcast %cst_2 : f32 to vector<1x32xf32>
    %3 = arith.divf %1, %2 : vector<1x32xf32>
    %c0_3 = arith.constant 0 : index
    %c0_4 = arith.constant 0 : index
    %4 = vector.load %arg2[%c0_3, %c0_4] : memref<32x2xf32, #tpu.memory_space<vmem>>, vector<32x2xf32>
    %cst_5 = arith.constant dense<0.000000e+00> : vector<1x2xf32>
    %5 = tpu.matmul %3, %4, %cst_5 {dimension_numbers = #tpu.dot_dimension_numbers<[1], [0], [0], [1], [0, 0, 1, 1], [], []>, precision = #tpu.contract_precision<fp32>} : vector<1x32xf32>, vector<32x2xf32>, vector<1x2xf32> -> vector<1x2xf32>
    %cst_6 = arith.constant 0.000000e+00 : f32
    %6 = vector.broadcast %cst_6 : f32 to vector<1x2xf32>
    %7 = arith.maximumf %5, %6 : vector<1x2xf32>
    %c0_7 = arith.constant 0 : index
    %c0_8 = arith.constant 0 : index
    %8 = vector.load %arg3[%c0_7, %c0_8] : memref<2x32xf32, #tpu.memory_space<vmem>>, vector<2x32xf32>
    %cst_9 = arith.constant dense<0.000000e+00> : vector<1x32xf32>
    %9 = tpu.matmul %7, %8, %cst_9 {dimension_numbers = #tpu.dot_dimension_numbers<[1], [0], [0], [1], [0, 0, 1, 1], [], []>, precision = #tpu.contract_precision<fp32>} : vector<1x2xf32>, vector<2x32xf32>, vector<1x32xf32> -> vector<1x32xf32>
    %10 = arith.negf %9 : vector<1x32xf32>
    %11 = math.exp %10 : vector<1x32xf32>
    %cst_10 = arith.constant 1.000000e+00 : f32
    %12 = vector.broadcast %cst_10 : f32 to vector<1x32xf32>
    %13 = arith.addf %12, %11 : vector<1x32xf32>
    %14 = arith.divf %12, %13 : vector<1x32xf32>
    %c0_11 = arith.constant 0 : index
    %c0_12 = arith.constant 0 : index
    %c0_13 = arith.constant 0 : index
    %15 = vector.load %arg1[%c0_11, %c0_12, %c0_13] : memref<1x32x256xf32, #tpu.memory_space<vmem>>, vector<1x32x256xf32>
    %16 = vector.shape_cast %14 : vector<1x32xf32> to vector<1x32x1xf32>
    %17 = vector.broadcast %16 : vector<1x32x1xf32> to vector<1x32x256xf32>
    %18 = arith.mulf %15, %17 : vector<1x32x256xf32>
    %cst_14 = arith.constant dense<0.000000e+00> : vector<1x256xf32>
    %19 = vector.multi_reduction <add>, %18, %cst_14 [1] : vector<1x32x256xf32> to vector<1x256xf32>
    %cst_15 = arith.constant 3.125000e-02 : f32
    %20 = vector.broadcast %cst_15 : f32 to vector<1x256xf32>
    %21 = arith.mulf %19, %20 : vector<1x256xf32>
    %c0_16 = arith.constant 0 : index
    %c0_17 = arith.constant 0 : index
    %22 = vector.load %arg4[%c0_16, %c0_17] : memref<9x256xf32, #tpu.memory_space<vmem>>, vector<9x256xf32>
    %cst_18 = arith.constant 0.000000e+00 : f32
    %23 = vector.broadcast %cst_18 : f32 to vector<1x256xf32>
    %c17_i32 = arith.constant 17 : i32
    %24 = tpu.dynamic_rotate %21 by %c17_i32 dim 1 : vector<1x256xf32>, i32 -> vector<1x256xf32>
    %25 = vector.extract_strided_slice %22 {offsets = [0, 0], sizes = [1, 256], strides = [1, 1]} : vector<9x256xf32> to vector<1x256xf32>
    %26 = arith.mulf %25, %24 : vector<1x256xf32>
    %27 = arith.addf %23, %26 : vector<1x256xf32>
    %c16_i32 = arith.constant 16 : i32
    %28 = tpu.dynamic_rotate %21 by %c16_i32 dim 1 : vector<1x256xf32>, i32 -> vector<1x256xf32>
    %29 = vector.extract_strided_slice %22 {offsets = [1, 0], sizes = [1, 256], strides = [1, 1]} : vector<9x256xf32> to vector<1x256xf32>
    %30 = arith.mulf %29, %28 : vector<1x256xf32>
    %31 = arith.addf %27, %30 : vector<1x256xf32>
    %c15_i32 = arith.constant 15 : i32
    %32 = tpu.dynamic_rotate %21 by %c15_i32 dim 1 : vector<1x256xf32>, i32 -> vector<1x256xf32>
    %33 = vector.extract_strided_slice %22 {offsets = [2, 0], sizes = [1, 256], strides = [1, 1]} : vector<9x256xf32> to vector<1x256xf32>
    %34 = arith.mulf %33, %32 : vector<1x256xf32>
    %35 = arith.addf %31, %34 : vector<1x256xf32>
    %c1_i32 = arith.constant 1 : i32
    %36 = tpu.dynamic_rotate %21 by %c1_i32 dim 1 : vector<1x256xf32>, i32 -> vector<1x256xf32>
    %37 = vector.extract_strided_slice %22 {offsets = [3, 0], sizes = [1, 256], strides = [1, 1]} : vector<9x256xf32> to vector<1x256xf32>
    %38 = arith.mulf %37, %36 : vector<1x256xf32>
    %39 = arith.addf %35, %38 : vector<1x256xf32>
    %40 = vector.extract_strided_slice %22 {offsets = [4, 0], sizes = [1, 256], strides = [1, 1]} : vector<9x256xf32> to vector<1x256xf32>
    %41 = arith.mulf %40, %21 : vector<1x256xf32>
    %42 = arith.addf %39, %41 : vector<1x256xf32>
    %c255_i32 = arith.constant 255 : i32
    %43 = tpu.dynamic_rotate %21 by %c255_i32 dim 1 : vector<1x256xf32>, i32 -> vector<1x256xf32>
    %44 = vector.extract_strided_slice %22 {offsets = [5, 0], sizes = [1, 256], strides = [1, 1]} : vector<9x256xf32> to vector<1x256xf32>
    %45 = arith.mulf %44, %43 : vector<1x256xf32>
    %46 = arith.addf %42, %45 : vector<1x256xf32>
    %c241_i32 = arith.constant 241 : i32
    %47 = tpu.dynamic_rotate %21 by %c241_i32 dim 1 : vector<1x256xf32>, i32 -> vector<1x256xf32>
    %48 = vector.extract_strided_slice %22 {offsets = [6, 0], sizes = [1, 256], strides = [1, 1]} : vector<9x256xf32> to vector<1x256xf32>
    %49 = arith.mulf %48, %47 : vector<1x256xf32>
    %50 = arith.addf %46, %49 : vector<1x256xf32>
    %c240_i32 = arith.constant 240 : i32
    %51 = tpu.dynamic_rotate %21 by %c240_i32 dim 1 : vector<1x256xf32>, i32 -> vector<1x256xf32>
    %52 = vector.extract_strided_slice %22 {offsets = [7, 0], sizes = [1, 256], strides = [1, 1]} : vector<9x256xf32> to vector<1x256xf32>
    %53 = arith.mulf %52, %51 : vector<1x256xf32>
    %54 = arith.addf %50, %53 : vector<1x256xf32>
    %c239_i32 = arith.constant 239 : i32
    %55 = tpu.dynamic_rotate %21 by %c239_i32 dim 1 : vector<1x256xf32>, i32 -> vector<1x256xf32>
    %56 = vector.extract_strided_slice %22 {offsets = [8, 0], sizes = [1, 256], strides = [1, 1]} : vector<9x256xf32> to vector<1x256xf32>
    %57 = arith.mulf %56, %55 : vector<1x256xf32>
    %58 = arith.addf %54, %57 : vector<1x256xf32>
    %c0_19 = arith.constant 0 : index
    %59 = memref.load %arg5[%c0_19] : memref<1xf32, #tpu.memory_space<smem>>
    %60 = vector.broadcast %59 : f32 to vector<1x256xf32>
    %61 = arith.addf %58, %60 : vector<1x256xf32>
    %62 = arith.negf %61 : vector<1x256xf32>
    %63 = math.exp %62 : vector<1x256xf32>
    %cst_20 = arith.constant 1.000000e+00 : f32
    %64 = vector.broadcast %cst_20 : f32 to vector<1x256xf32>
    %65 = arith.addf %64, %63 : vector<1x256xf32>
    %66 = arith.divf %64, %65 : vector<1x256xf32>
    %67 = vector.shape_cast %66 : vector<1x256xf32> to vector<1x1x256xf32>
    %68 = vector.broadcast %67 : vector<1x1x256xf32> to vector<1x32x256xf32>
    %69 = arith.mulf %18, %68 : vector<1x32x256xf32>
    %c0_21 = arith.constant 0 : index
    %c0_22 = arith.constant 0 : index
    %c0_23 = arith.constant 0 : index
    %70 = vector.load %arg6[%c0_21, %c0_22, %c0_23] : memref<1x32x256xf32, #tpu.memory_space<vmem>>, vector<1x32x256xf32>
    tpu.vector_store %arg6[%c0_21, %c0_22, %c0_23], %69 {strides = array<i32>} : memref<1x32x256xf32, #tpu.memory_space<vmem>>, vector<1x32x256xf32>,
    return
  }
  func.func @transform_0(%arg0: i32) -> (i32, i32, i32) {
    %c0_i32 = arith.constant 0 : i32
    %c0_i32_0 = arith.constant 0 : i32
    %c0_i32_1 = arith.constant 0 : i32
    return %arg0, %c0_i32, %c0_i32_0 : i32, i32, i32
  }
  func.func @transform_1(%arg0: i32) -> (i32, i32) {
    %c0_i32 = arith.constant 0 : i32
    %c0_i32_0 = arith.constant 0 : i32
    %c0_i32_1 = arith.constant 0 : i32
    return %c0_i32, %c0_i32_0 : i32, i32
  }
  func.func @transform_2(%arg0: i32) -> (i32, i32) {
    %c0_i32 = arith.constant 0 : i32
    %c0_i32_0 = arith.constant 0 : i32
    %c0_i32_1 = arith.constant 0 : i32
    return %c0_i32, %c0_i32_0 : i32, i32
  }
  func.func @transform_3(%arg0: i32) -> (i32, i32) {
    %c0_i32 = arith.constant 0 : i32
    %c0_i32_0 = arith.constant 0 : i32
    %c0_i32_1 = arith.constant 0 : i32
    return %c0_i32, %c0_i32_0 : i32, i32
  }
  func.func @transform_4(%arg0: i32) -> i32 {
    %c0_i32 = arith.constant 0 : i32
    %c0_i32_0 = arith.constant 0 : i32
    return %c0_i32 : i32
  }
  func.func @transform_5(%arg0: i32) -> (i32, i32, i32) {
    %c0_i32 = arith.constant 0 : i32
    %c0_i32_0 = arith.constant 0 : i32
    %c0_i32_1 = arith.constant 0 : i32
    return %arg0, %c0_i32, %c0_i32_0 : i32, i32, i32
  }
}

</mosaic_0001>

<bundles_post_ra>
// kernel: tpu_custom_call.1
= control target key start
LH: loop header
LB: loop body
LE: loop exit
PB: predicated region body
PF: predicated region fallthrough
CT: control target
= control target key end

     0   :  { %s2437_s0 = inlined_call_operand.hbm [shape: f32[2,32,256], index: 0, kind: input, shape index: {}]   ;;  %s2438_s1 = inlined_call_operand.vmem [shape: f32[32,2], index: 1, kind: input, shape index: {}]   ;;  %s2439_s2 = inlined_call_operand.vmem [shape: f32[2,32], index: 2, kind: input, shape index: {}]   ;;  %s2440_s3 = inlined_call_operand.vmem [shape: f32[9,256], index: 3, kind: input, shape index: {}]   ;;  %s2441_s4 = inlined_call_operand.<no memory space> [shape: f32[1], index: 4, kind: input, shape index: {}]   ;;  %s2442_s5 = inlined_call_operand.hbm [shape: f32[2,32,256], index: 5, kind: output, shape index: {}]  }
   0x1   :  { %10 = sst [smem:[#allocation2]] %s2441_s4 }
   0x2   :  { %11 = vsyncpa [#allocation4], 0 }
   0x3   :  { %13 = vsyncpa [#allocation4 + $0x1], 0 }
   0x4   :  { %14 = vsyncpa [#allocation5], 0 }
   0x5   :  { %16 = vsyncpa [#allocation5 + $0x1], 0  ;;  %s2033_s20 = smov 0   ;;  %s2035_s21 = smov 0  }
   0x6   :  { %s2037_s22 = smov 0   ;;  %s2039_s23 = smov 0  }
   0x7 LB: > { %s2054_s4 = sadd.s32 4294967295, %s1982_s23   ;;  %s1602_s24 = sadd.s32 4294967294, %s1982_s23   ;;  %s1982_s23 = sphi %s2039_s23, %s2455_s23   ;;  %s1978_s22 = sphi %s2037_s22, %s2454_s22   ;;  %s1974_s21 = sphi %s2035_s21, %s2453_s21   ;;  %s1970_s20 = sphi %s2033_s20, %s2452_s20  }
   0x8   : > { %s2058_s25 = sadd.s32 1, %s1982_s23   ;;  %s29_s26 = sadd.s32 1, %s1978_s22 }
   0x9   : > { %s26_s27 = ssub.s32 %s1982_s23, %s2058_s25  ;;  %p36_p0 = scmp.ne.s32.totalorder %s1978_s22, %s1974_s21 }
   0xa   : > { %p27_p1 = scmp.eq.s32.totalorder %s26_s27, 0  ;;  %p37_p2 = scmp.eq.s32.totalorder %s1982_s23, 0 }
   0xb   : > { %p42_p3 = scmp.ne.s32.totalorder %s1974_s21, %s1970_s20  ;;  %p43_p4 = scmp.eq.s32.totalorder %s2054_s4, 0 }
   0xc   : > { %s2070_s28 = scalar_select %p27_p1, %s1978_s22, %s29_s26  }
   0xd   : > { %p2072_p5 = por %p37_p2, %p36_p0  ;;  %p2076_p6 = por %p43_p4, %p42_p3 }
   0xe   : > { %p150_p7 = scmp.eq.s32.totalorder %s2054_s4, 1  ;;  %p156_p8 = scmp.eq.s32.totalorder %s1602_s24, 1 }
   0xf   : > { %p1826_p10 = scmp.lt.s32.totalorder %s1982_s23, 2  ;;  %s188_s8 = sand.u32 1, %s1978_s22  }
  0x10   : > { %p2083_p11 = por %p150_p7, %p36_p0  ;;  %p2087_p12 = por %p156_p8, %p42_p3 }
  0x11   : > { %s1619_s9 = sshll.u32 %s1982_s23, 10  ;;  %s1605_s10 = sshll.u32 %s188_s8, 6 }
  0x12   : > { %s2446_s6 = scalar_select %p2083_p11, 1, 0 }
  0x13   : > { %s2447_s7 = scalar_select %p2087_p12, 1, 0 }
  0x14   : > { %s2096_s13 = scalar_lea.hbm %s2437_s0, %s1619_s9  ;;  %s192_s14 = scalar_lea.vmem [#allocation3], %s1605_s10 }
  0x15   : > { %s199_s15 = sshll.u32 %s192_s14, 4  ;;  %p2100_p13 = pnand %p1826_p10, %p2072_p5  ;;  %s2104_s15 = int_to_ptr.vmem [resolvable:$true] %s199_s15 }
  0x16   : > { %s2106_s17 = scalar_lea.sflag [#allocation4], %s188_s8  ;;  %s1886_s18 = scalar_lea.hbm %s2096_s13, 1024 }
  0x17   : > { %p1887_p0 = scmp.ne.s32.totalorder %s2096_s13, %s1886_s18  ;;  %p1888_p1 = pneg %p2100_p13 }
  0x18   : > { %s1891_s26 = scalar_lea.hbm %s2437_s0, 2048  ;;  %p1892_p4 = scmp.lt.u32.totalorder %s2096_s13, %s2437_s0 }
  0x19   : > { %p1889_p2 = pnand %p1888_p1, %p1887_p0  ;;  %p1893_p5 = scmp.lt.u32.totalorder %s1891_s26, %s1886_s18 }
  0x1a   : > { %p1895_p8 = scmp.lt.u32.totalorder %s1886_s18, %s2096_s13 }
  0x1b   : > { %p1890_p3 = pneg %p1889_p2  ;;  %p1894_p7 = por %p1893_p5, %p1892_p4 }
  0x1d   : > { %p1896_p10 = por %p1895_p8, %p1894_p7 }
  0x1f   : > { %p1897_p9 = pnand %p1896_p10, %p1890_p3 }
  0x21   : > { %1900 = shalt.err (!%p1897_p9)
}
  0x22   : > { %s1901_s8 = scalar_lea.vmem %s2104_s15, 1024  ;;  %s1984_s9 = smov [#allocation3]  }
  0x23   : > { %p1902_p0 = scmp.ne.s32.totalorder %s2104_s15, %s1901_s8  ;;  %s1906_s10 = sshll.u32 %s1984_s9, 4  ;;  %s1907_s10 = int_to_ptr.vmem [resolvable:$false] %s1906_s10 }
  0x24   : > { %s1908_s11 = scalar_lea.vmem %s1907_s10, 2048  ;;  %p1909_p11 = scmp.lt.s32.totalorder %s2104_s15, %s1907_s10 }
  0x25   : > { %p1904_p2 = pnand %p1902_p0, %p1888_p1  ;;  %p1910_p4 = scmp.lt.s32.totalorder %s1908_s11, %s1901_s8 }
  0x27   : > { %p1905_p12 = pneg %p1904_p2  ;;  %p1911_p5 = por %p1910_p4, %p1909_p11 }
  0x29   : > { %p1912_p7 = pnand %p1911_p5, %p1905_p12 }
  0x2b   : > { %1915 = shalt.err (!%p1912_p7)
}
  0x2c   : > { %s1985_s12 = smov 256   ;;  %s1986_s14 = smov 16  }
  0x2d   : > { %1821 = dma.hbm_to_vmem [thread:$0]  (!%p2100_p13), %s2096_s13, 1024, %s2104_s15, %s2106_s17, %s1985_s12, %s1985_s12, %s1986_s14  }
  0x2e   : > { %p1608_p9 = scmp.ge.s32.totalorder %s1982_s23, 1  ;;  %p207_p1 = scmp.lt.s32.totalorder %s1982_s23, 3 }
  0x30   : > { %p208_p3 = pnand %p1608_p9, %p207_p1 }
  0x31   : > { %s2137_s18 = sand.u32 (!%p208_p3), 1, %s1974_s21  }
  0x32   : > { %211 = sbr.rel (%p208_p3) target bundleno = 1097 (0x449), region = 40  ;;  %s1609_s19 = sshll.u32 (!%p208_p3), %s2137_s18, 6 }
  0x33   : > { %s214_s24 = scalar_lea.sflag (!%p208_p3), [#allocation4], %s2137_s18  ;;  %s217_s26 = scalar_lea.vmem (!%p208_p3), [#allocation3], %s1609_s19 }
  0x39   : > { %1961 = dma.done.wait (%p2076_p6), %s214_s24, 1024  }
  0x3a   : > { %1963 = vsyncadd (%p2076_p6), %s214_s24, 4294966272  ;;  %v2147_v0 = vld [vmem:[%s217_s26] sm:$0xff]  ;;  %v2149_v1 = vld [vmem:[%s217_s26 + $0x8] sm:$0xff]  ;;  %v1987_v34 = vmov 0.0|0.0   ;;  %vm1988_vm0 = vmmov 0   ;;  %v1989_v39 = vmov 0.0   ;;  %v277_v46 = vlaneseq }
  0x3b   : > { %v2151_v2 = vld [vmem:[%s217_s26 + $0x20] sm:$0xff]  ;;  %v252_v3 = vadd.f32 %v2149_v1, %v2147_v0  ;;  %v2155_v4 = vld [vmem:[%s217_s26 + $0x28] sm:$0xff]  ;;  %v2157_v5 = vld [vmem:[%s217_s26 + $0x10] sm:$0xff]  ;;  %1765 = vmatprep.subr.bf16.mxu0 %v1987_v34  ;;  %1759 = vmatprep.subr.bf16.mxu1 %v1987_v34  ;;  %vm288_vm1 = vcmask 130112   ;;  %vm295_vm2 = vcmask 195712   ;;  %vm302_vm3 = vcmask 261312  }
  0x3c   : > { %v2159_v6 = vld [vmem:[%s217_s26 + $0x18] sm:$0xff]  ;;  %v258_v7 = vadd.f32 %v2155_v4, %v2151_v2  ;;  %v2163_v8 = vld [vmem:[%s217_s26 + $0x30] sm:$0xff]  ;;  %v269_v12 = vld [vmem:[%s2438_s1] sm:$0xff]  ;;  %1682 = vmatprep.mubr.msk.f32.mxu0 %vm1988_vm0, %v1989_v39  ;;  %1671 = vmatprep.mubr.msk.f32.mxu1 %vm1988_vm0, %v1989_v39  ;;  %v2219_v47 = vand.u32 127, %v277_v46  ;;  %v2221_v48 = vshrl.u32 %v277_v46, 7  ;;  %vm304_vm4 = vcmask 261120  }
  0x3d   : > { %v2165_v9 = vld [vmem:[%s217_s26 + $0x38] sm:$0xff]  ;;  %253 = vadd.xlane.f32.xlu0 %v252_v3  ;;  %v255_v10 = vadd.f32 %v2159_v6, %v2157_v5  ;;  %v270_v13 = vld [vmem:[%s2438_s1 + $0x8] sm:$0xff]  ;;  %v308_v14 = vand.u32 4294901760, %v269_v12  ;;  %v271_v18 = vld [vmem:[%s2438_s1 + $0x10] sm:$0xff]  ;;  %vm798_vm5 = vcmask 1041408   ;;  %vm794_vm6 = vcmask 15360  }
  0x3e   : > { %259 = vadd.xlane.f32.xlu1 %v258_v7  ;;  %v261_v11 = vadd.f32 %v2165_v9, %v2163_v8  ;;  %v311_v15 = vand.u32 4294901760, %v270_v13  ;;  %v272_v19 = vld [vmem:[%s2438_s1 + $0x18] sm:$0xff]  ;;  %v314_v22 = vand.u32 4294901760, %v271_v18  ;;  %v283_v49 = vadd.s32 4294967288, %v2219_v47  ;;  %s1990_s11 = smov 16   ;;  %s1991_s12 = smov 15  }
  0x3f   : > { %v2177_v16 = vsub.f32 %v269_v12, %v308_v14  ;;  %v317_v23 = vand.u32 4294901760, %v272_v19  ;;  %v290_v51 = vadd.s32 4294967280, %v2219_v47  ;;  %v297_v52 = vadd.s32 4294967272, %v2219_v47  ;;  %s1992_s14 = smov 17   ;;  %s1993_s24 = smov 1  }
  0x40   : > { %v2179_v17 = vsub.f32 %v270_v13, %v311_v15  ;;  %v2191_v26 = vsub.f32 %v271_v18, %v314_v22  ;;  %v2207_v41 = vpack.c.bf16 %v311_v15, %v308_v14  ;;  %v281_v54 = vsub.s32 %v2219_v47, %v2221_v48  ;;  %s1994_s26 = smov 127   ;;  %s1995_s30 = smov 113  }
  0x41   : > { %256 = vadd.xlane.f32.xlu0 %v255_v10  ;;  %v389_v20 = vand.u32 4294901760, %v2177_v16  ;;  %v2193_v27 = vsub.f32 %v272_v19, %v317_v23  ;;  %v2215_v43 = vpack.c.bf16 %v317_v23, %v314_v22  ;;  %v286_v56 = vsub.s32 %v283_v49, %v2221_v48  ;;  %s1996_s13 = smov 112   ;;  %s1997_s15 = smov 111  }
  0x42   : > { %262 = vadd.xlane.f32.xlu1 %v261_v11  ;;  %v396_v21 = vand.u32 4294901760, %v2179_v17  ;;  %v403_v30 = vand.u32 4294901760, %v2191_v26  ;;  %v1772_v40 = vpack.c.bf16 %v2179_v17, %v2177_v16  ;;  %1761 = vmatpush3.bf16.msra.mxu1 %v2207_v41  ;;  %v293_v57 = vsub.s32 %v290_v51, %v2221_v48  ;;  %s1475_s8 = sld [smem:[#allocation2]]  ;;  %p2449_p11 = scmp.ne.s32.totalorder %s2446_s6, 0 }
  0x43   : > { %v390_v24 = vsub.f32 %v2177_v16, %v389_v20  ;;  %v410_v31 = vand.u32 4294901760, %v2193_v27  ;;  %1762 = vmatprep.subr.bf16.mxu1 %v1987_v34  ;;  %v1775_v42 = vpack.c.bf16 %v2193_v27, %v2191_v26  ;;  %v300_v60 = vsub.s32 %v297_v52, %v2221_v48  ;;  %s1998_s17 = smov [#allocation6]  }
  0x44   : > { %v397_v25 = vsub.f32 %v2179_v17, %v396_v21  ;;  %v404_v33 = vsub.f32 %v2191_v26, %v403_v30  ;;  %v1784_v44 = vpack.c.bf16 %v396_v21, %v389_v20  ;;  %v793_v21 = vld [vmem:[%s2439_s2] sm:$0x3]  ;;  %v2271_v46 = vsub.s32 0, %v2221_v48  ;;  %s1920_s27 = sshll.u32 %s1998_s17, 4  ;;  %s1921_s27 = int_to_ptr.vmem [resolvable:$false] %s1920_s27 }
  0x45   : > { %v391_v28 = vand.u32 4294901760, %v390_v24  ;;  %v411_v35 = vsub.f32 %v2193_v27, %v410_v31  ;;  %v1787_v45 = vpack.c.bf16 %v410_v31, %v403_v30  ;;  %v800_v22 = vsel %vm798_vm5, %v793_v21, 0  ;;  %s1922_s29 = scalar_lea.vmem %s1921_s27, 2048 }
  0x46   : > { %v398_v29 = vand.u32 4294901760, %v397_v25  ;;  %v405_v36 = vand.u32 4294901760, %v404_v33  ;;  %1764 = vmatpush3.bf16.msra.mxu1 %v2215_v43  ;;  %v803_v23 = vand.u32 4294901760, %v800_v22  ;;  %vm1320_vm7 = vcmp.lt.s32.totalorder %v2219_v47, 16 }
  0x47   : > { %v412_v37 = vand.u32 4294901760, %v411_v35  ;;  %1729 = vmatprep.subr.mxu1 %v1989_v39  ;;  %vm1343_vm8 = vcmp.lt.s32.totalorder %v2219_v47, 15  ;;  %vm1309_vm9 = vcmp.lt.s32.totalorder %v2219_v47, 17  ;;  %vm1366_vm10 = vcmp.lt.s32.totalorder %v2219_v47, 1 }
  0x48   : > { %v1766_v32 = vpack.c.bf16 %v398_v29, %v391_v28  ;;  %v880_v29 = vsub.f32 %v800_v22, %v803_v23  ;;  %vm1399_vm11 = vcmp.lt.s32.totalorder %v2219_v47, 127  ;;  %vm1422_vm12 = vcmp.lt.s32.totalorder %v2219_v47, 113 }
  0x49   : > { %v1769_v38 = vpack.c.bf16 %v412_v37, %v405_v36  ;;  %vm1445_vm13 = vcmp.lt.s32.totalorder %v2219_v47, 112  ;;  %vm1468_vm14 = vcmp.lt.s32.totalorder %v2219_v47, 111 }
  0x4a   : > { %1767 = vmatpush3.bf16.msra.mxu0 %v1766_v32  ;;  %v881_v32 = vand.u32 4294901760, %v880_v29 }
  0x4b   : > { %1768 = vmatprep.subr.bf16.mxu0 %v1987_v34 }
  0x4c   : > { %v882_v35 = vsub.f32 %v880_v29, %v881_v32 }
  0x4e   : > { %1770 = vmatpush3.bf16.msra.mxu0 %v1769_v38  ;;  %v883_v38 = vand.u32 4294901760, %v882_v35 }
  0x4f   : > { %1771 = vmatprep.subr.bf16.mxu0 %v1987_v34 }
  0xca   : > { %v254_v50 = vpop.xlane.xlu0 %253 }
  0xcb   : > { %v260_v53 = vpop.xlane.xlu1 %259  ;;  %v265_v55 = vmul.f32 0.00390625, %v254_v50 }
  0xcc   : > { %v267_v58 = vmul.f32 0.00390625, %v260_v53 }
  0xcd   : > { %v282_v3 = vrot.slane %v265_v55, %v281_v54 }
  0xce   : > { %v257_v59 = vpop.xlane.xlu0 %256  ;;  %v294_v10 = vrot.slane %v267_v58, %v293_v57 }
  0xcf   : > { %v266_v61 = vmul.f32 0.00390625, %v257_v59  ;;  %v263_v62 = vpop.xlane.xlu1 %262 }
  0xd0   : > { %v268_v63 = vmul.f32 0.00390625, %v263_v62 }
  0xd1   : > { %v287_v7 = vrot.slane %v266_v61, %v286_v56 }
  0xd2   : > { %v301_v11 = vrot.slane %v268_v63, %v300_v60 }
  0xd3   : > { %v289_v12 = vsel %vm288_vm1, %v287_v7, %v282_v3 }
  0xd4   : > { %v296_v13 = vsel %vm295_vm2, %v294_v10, %v289_v12 }
  0xd5   : > { %v303_v14 = vsel %vm302_vm3, %v301_v11, %v296_v13 }
  0xd6   : > { %v305_v15 = vsel %vm304_vm4, %v303_v14, 0 }
  0xd7   : > { %v376_v16 = vand.u32 4294901760, %v305_v15 }
  0xd9   : > { %1683 = vmatmul.mubr.f32.vlgmr.msra.gmra.mrb[0].mxu0 %v376_v16  ;;  %v377_v17 = vsub.f32 %v305_v15, %v376_v16 }
  0xda   : > { %1773 = vmatpush3.bf16.msra.mxu0 %v1772_v40  ;;  %1693 = vmatprep.mubr.msk.f32.mxu0 %vm1988_vm0, %v1989_v39 }
  0xdb   : > { %1774 = vmatprep.subr.bf16.mxu0 %v1987_v34  ;;  %v378_v18 = vand.u32 4294901760, %v377_v17 }
  0xdd   : > { %v379_v19 = vsub.f32 %v377_v17, %v378_v18 }
  0xde   : > { %1776 = vmatpush3.bf16.msra.mxu0 %v1775_v42 }
  0xdf   : > { %1777 = vmatprep.subr.bf16.mxu0 %v1987_v34  ;;  %v380_v20 = vand.u32 4294901760, %v379_v19 }
  0xe1   : > { %1672 = vmatmul.mubr.f32.vlgmr.msra.gmra.mrb[0].mxu1 %v380_v20  ;;  %1694 = vmatmul.mubr.f32.vlgmr.msra.gmra.mrb[0].mxu0 %v377_v17 }
  0xe2   : > { %1779 = vmatpush3.bf16.msra.mxu0 %v2207_v41  ;;  %1704 = vmatprep.mubr.msk.f32.mxu0 %vm1988_vm0, %v1989_v39 }
  0xe3   : > { %1780 = vmatprep.subr.bf16.mxu0 %v1987_v34  ;;  %1731 = vmatprep.mubr.msk.f32.mxu1 %vm1988_vm0, %v1989_v39 }
  0xe4   : > { %1730 = vmatpush3.msra.mxu1 %v803_v23 }
  0xe5   : > { %1734 = vmatprep.subr.mxu1 %v1989_v39 }
  0xe6   : > { %1782 = vmatpush3.bf16.msra.mxu0 %v2215_v43 }
  0xe7   : > { %1783 = vmatprep.subr.bf16.mxu0 %v1987_v34 }
  0xe9   : > { %1705 = vmatmul.mubr.f32.vlgmr.msra.gmra.mrb[0].mxu0 %v378_v18 }
  0xea   : > { %1785 = vmatpush3.bf16.msra.mxu0 %v1784_v44  ;;  %1715 = vmatprep.mubr.msk.f32.mxu0 %vm1988_vm0, %v1989_v39 }
  0xeb   : > { %1786 = vmatprep.subr.bf16.mxu0 %v1987_v34 }
  0xee   : > { %1788 = vmatpush3.bf16.msra.mxu0 %v1787_v45 }
  0xef   : > { %1789 = vmatprep.subr.bf16.mxu0 %v1987_v34 }
  0xf1   : > { %1716 = vmatmul.mubr.f32.vlgmr.msra.gmra.mrb[0].mxu0 %v376_v16 }
  0xf2   : > { %1791 = vmatpush3.bf16.msra.mxu0 %v2207_v41  ;;  %1726 = vmatprep.mubr.msk.f32.mxu0 %vm1988_vm0, %v1989_v39 }
  0xf3   : > { %1792 = vmatprep.subr.bf16.mxu0 %v1987_v34 }
  0xf6   : > { %1794 = vmatpush3.bf16.msra.mxu0 %v2215_v43 }
  0xf9   : > { %1727 = vmatmul.mubr.f32.vlgmr.msra.gmra.mrb[0].mxu0 %v376_v16 }
 0x1b4   : > { %v382_v24 = vpop.f32.mrb[0].mxu1 }
 0x1b5   : > { %v1673_v25 = vpop.f32.mrb[1].mxu1 }
 0x1cc   : > { %v788_v26 = vpop.f32.mrb[0].mxu0 }
 0x1cd   : > { %v1795_v27 = vadd.f32 %v788_v26, %v382_v24  ;;  %v1728_v28 = vpop.f32.mrb[1].mxu0 }
 0x1ce   : > { %v2338_v28 = vld [vmem:[%s2440_s3 + $0x8] sm:$0xff] }
 0x1cf   : > { %v792_v30 = vmax.f32 %v1795_v27, 0.0  ;;  %v2333_v27 = vld [vmem:[%s2440_s3] sm:$0xff] }
 0x1d1   : > { %v796_v31 = vsel %vm794_vm6, %v792_v30, 0 }
 0x1d2   : > { %v868_v33 = vand.u32 4294901760, %v796_v31 }
 0x1d4   : > { %v869_v34 = vsub.f32 %v796_v31, %v868_v33 }
 0x1d6   : > { %v870_v36 = vand.u32 4294901760, %v869_v34 }
 0x1d8   : > { %v871_v37 = vsub.f32 %v869_v34, %v870_v36 }
 0x1da   : > { %v872_v40 = vand.u32 4294901760, %v871_v37 }
 0x1dc   : > { %1732 = vmatmul.mubr.f32.vlgmr.msra.gmra.mrb[2].mxu1 %v872_v40 }
 0x1dd   : > { %1735 = vmatpush3.msra.mxu1 %v883_v38  ;;  %1736 = vmatprep.mubr.msk.f32.mxu1 %vm1988_vm0, %v1989_v39 }
 0x1de   : > { %1739 = vmatprep.subr.mxu1 %v1989_v39 }
 0x1e4   : > { %1737 = vmatmul.mubr.f32.vlgmr.msra.gmra.mrb[2].mxu1 %v868_v33 }
 0x1e5   : > { %1740 = vmatpush3.msra.mxu1 %v880_v29  ;;  %1741 = vmatprep.mubr.msk.f32.mxu1 %vm1988_vm0, %v1989_v39 }
 0x1e6   : > { %1744 = vmatprep.subr.mxu1 %v1989_v39 }
 0x1ec   : > { %1742 = vmatmul.mubr.f32.vlgmr.msra.gmra.mrb[2].mxu1 %v869_v34 }
 0x1ed   : > { %1745 = vmatpush3.msra.mxu1 %v803_v23  ;;  %1746 = vmatprep.mubr.msk.f32.mxu1 %vm1988_vm0, %v1989_v39 }
 0x1ee   : > { %1749 = vmatprep.subr.mxu1 %v1989_v39 }
 0x1f4   : > { %1747 = vmatmul.mubr.f32.vlgmr.msra.gmra.mrb[2].mxu1 %v870_v36 }
 0x1f5   : > { %1750 = vmatpush3.msra.mxu1 %v881_v32  ;;  %1751 = vmatprep.mubr.msk.f32.mxu1 %vm1988_vm0, %v1989_v39 }
 0x1f6   : > { %1754 = vmatprep.subr.mxu1 %v1989_v39 }
 0x1fc   : > { %1752 = vmatmul.mubr.f32.vlgmr.msra.gmra.mrb[2].mxu1 %v868_v33 }
 0x1fd   : > { %1755 = vmatpush3.msra.mxu1 %v803_v23  ;;  %1756 = vmatprep.mubr.msk.f32.mxu1 %vm1988_vm0, %v1989_v39 }
 0x204   : > { %1757 = vmatmul.mubr.f32.vlgmr.msra.gmra.mrb[2].mxu1 %v868_v33 }
 0x2d7   : > { %v1244_v41 = vpop.f32.mrb[2].mxu1 }
 0x2d8   : > { %v1611_v42 = vmul.f32 -1.442695, %v1244_v41  ;;  %v1758_v43 = vpop.f32.mrb[3].mxu1 }
 0x2da   : > { %1874 = vpow2.f32 %v1611_v42 }
 0x2e4   : > { %v1875_v44 = vpop.eup %1874 }
 0x2e5   : > { %v1251_v45 = vadd.f32 1.0, %v1875_v44 }
 0x2e7   : > { %1876 = vrcp.f32 %v1251_v45 }
 0x2f1   : > { %v1877_v49 = vpop.eup %1876 }
 0x2f2   : > { %v1257_v50 = vrot.slane %v1877_v49, %v2271_v46 }
 0x2f4   : > { %1263 = vbcast.lane.b32.xlu1 %v1257_v50, 264  ;;  %1259 = vbcast.lane.b32.xlu0 %v1257_v50, 256 }
 0x2f8   : > { %1267 = vbcast.lane.b32.xlu1 %v1257_v50, 272 }
 0x2fc   : > { %1271 = vbcast.lane.b32.xlu1 %v1257_v50, 280 }
 0x366   : > { %v1264_v51 = vpop.permute.xlu1 %1263  ;;  %v1260_v39 = vpop.permute.xlu0 %1259 }
 0x367   : > { %v2275_v52 = vmul.f32 %v1264_v51, %v2157_v5  ;;  %v2278_v53 = vmul.f32 %v1264_v51, %v2159_v6  ;;  %v2281_v54 = vmul.f32 %v1260_v39, %v2147_v0  ;;  %v2284_v48 = vmul.f32 %v1260_v39, %v2149_v1 }
 0x369   : > { %v1281_v5 = vadd.f32 %v2275_v52, %v2281_v54  ;;  %v1290_v6 = vadd.f32 %v2278_v53, %v2284_v48 }
 0x36a   : > { %v1268_v55 = vpop.permute.xlu1 %1267 }
 0x36b   : > { %v2287_v56 = vmul.f32 %v1268_v55, %v2151_v2  ;;  %v2290_v57 = vmul.f32 %v1268_v55, %v2155_v4 }
 0x36d   : > { %v1282_v0 = vadd.f32 %v1281_v5, %v2287_v56  ;;  %v1291_v59 = vadd.f32 %v1290_v6, %v2290_v57 }
 0x36e   : > { %v1272_v58 = vpop.permute.xlu1 %1271 }
 0x36f   : > { %v2299_v1 = vmul.f32 %v1272_v58, %v2163_v8  ;;  %v2302_v2 = vmul.f32 %v1272_v58, %v2165_v9 }
 0x371   : > { %v1283_v4 = vadd.f32 %v1282_v0, %v2299_v1  ;;  %v1292_v60 = vadd.f32 %v1291_v59, %v2302_v2 }
 0x373   : > { %v1284_v61 = vrot.slane %v1283_v4, 4  ;;  %v1293_v62 = vrot.slane %v1292_v60, 4 }
 0x375   : > { %v1285_v63 = vadd.f32 %v1284_v61, %v1283_v4  ;;  %v1294_v3 = vadd.f32 %v1293_v62, %v1292_v60 }
 0x377   : > { %v1286_v7 = vrot.slane %v1285_v63, 2  ;;  %v1295_v10 = vrot.slane %v1294_v3, 2 }
 0x379   : > { %v1287_v11 = vadd.f32 %v1286_v7, %v1285_v63  ;;  %v1296_v12 = vadd.f32 %v1295_v10, %v1294_v3 }
 0x37b   : > { %v1288_v13 = vrot.slane %v1287_v11, 1  ;;  %v1297_v14 = vrot.slane %v1296_v12, 1 }
 0x37d   : > { %v1289_v15 = vadd.f32 %v1288_v13, %v1287_v11  ;;  %v1298_v8 = vadd.f32 %v1297_v14, %v1296_v12 }
 0x37f   : > { %v2306_v16 = vmul.f32 0.03125, %v1289_v15  ;;  %v2308_v9 = vmul.f32 0.03125, %v1298_v8 }
 0x381   : > { %1318 = vrot.lane.b32.xlu1 %v2308_v9, %s1990_s11  ;;  %1316 = vrot.lane.b32.xlu0 %v2306_v16, %s1990_s11  ;;  %v1386_v0 = vmul.f32 %v2338_v28, %v2308_v9  ;;  %v1385_v62 = vmul.f32 %v2333_v27, %v2306_v16 }
 0x385   : > { %1341 = vrot.lane.b32.xlu1 %v2308_v9, %s1991_s12  ;;  %1339 = vrot.lane.b32.xlu0 %v2306_v16, %s1991_s12 }
 0x389   : > { %1307 = vrot.lane.b32.xlu1 %v2308_v9, %s1992_s14  ;;  %1305 = vrot.lane.b32.xlu0 %v2306_v16, %s1992_s14 }
 0x38d   : > { %1364 = vrot.lane.b32.xlu1 %v2308_v9, %s1993_s24  ;;  %1362 = vrot.lane.b32.xlu0 %v2306_v16, %s1993_s24  ;;  %s1620_s24 = sshll.u32 %s2054_s4, 10 }
 0x38e   : > { %s2386_s4 = scalar_lea.hbm %s2442_s5, %s1620_s24 }
 0x391   : > { %1397 = vrot.lane.b32.xlu1 %v2308_v9, %s1994_s26  ;;  %1395 = vrot.lane.b32.xlu0 %v2306_v16, %s1994_s26  ;;  %s243_s26 = scalar_lea.vmem [#allocation6], %s1609_s19  ;;  %s1516_s19 = scalar_lea.sflag [#allocation5], %s2137_s18 }
 0x395   : > { %1420 = vrot.lane.b32.xlu1 %v2308_v9, %s1995_s30  ;;  %1418 = vrot.lane.b32.xlu0 %v2306_v16, %s1995_s30  ;;  %s1529_s30 = sshll.u32 %s243_s26, 4  ;;  %s2392_s30 = int_to_ptr.vmem [resolvable:$true] %s1529_s30 }
 0x396   : > { %s1916_s16 = scalar_lea.vmem %s2392_s30, 1024  ;;  %p1923_p8 = scmp.lt.s32.totalorder %s2392_s30, %s1921_s27 }
 0x397   : > { %p1917_p6 = scmp.ne.s32.totalorder %s2392_s30, %s1916_s16  ;;  %p1924_p10 = scmp.lt.s32.totalorder %s1922_s29, %s1916_s16 }
 0x399   : > { %1443 = vrot.lane.b32.xlu1 %v2308_v9, %s1996_s13  ;;  %1441 = vrot.lane.b32.xlu0 %v2306_v16, %s1996_s13  ;;  %p1918_p12 = pnand %p1917_p6, %p2449_p11  ;;  %p1925_p0 = por %p1924_p10, %p1923_p8 }
 0x39b   : > { %p1919_p13 = pneg %p1918_p12 }
 0x39d   : > { %1466 = vrot.lane.b32.xlu1 %v2308_v9, %s1997_s15  ;;  %1464 = vrot.lane.b32.xlu0 %v2306_v16, %s1997_s15  ;;  %p1926_p2 = pnand %p1925_p0, %p1919_p13 }
 0x3f3   : > { %v1319_v17 = vpop.permute.xlu1 %1318  ;;  %v1317_v18 = vpop.permute.xlu0 %1316 }
 0x3f4   : > { %v1321_v19 = vsel %vm1320_vm7, %v1317_v18, %v1319_v17  ;;  %v1322_v20 = vsel %vm1320_vm7, %v1319_v17, %v1317_v18 }
 0x3f5   : > { %v1325_v21 = vrot.slane %v1322_v20, 7  ;;  %v1326_v22 = vrot.slane %v1321_v19, 7 }
 0x3f7   : > { %v1342_v23 = vpop.permute.xlu1 %1341  ;;  %v1340_v24 = vpop.permute.xlu0 %1339  ;;  %v1329_v29 = vmul.f32 %v1325_v21, %v2333_v27  ;;  %v1330_v30 = vmul.f32 %v1326_v22, %v2338_v28  ;;  %v1390_v21 = vrot.slane %v1386_v0, 4  ;;  %v1389_v22 = vrot.slane %v1385_v62, 4 }
 0x3f8   : > { %v1344_v25 = vsel %vm1343_vm8, %v1340_v24, %v1342_v23  ;;  %v1345_v26 = vsel %vm1343_vm8, %v1342_v23, %v1340_v24 }
 0x3f9   : > { %v1348_v31 = vrot.slane %v1345_v26, 6  ;;  %v1349_v32 = vrot.slane %v1344_v25, 6  ;;  %v1333_v40 = vrot.slane %v1329_v29, 1  ;;  %v1334_v41 = vrot.slane %v1330_v30, 1 }
 0x3fb   : > { %v1308_v33 = vpop.permute.xlu1 %1307  ;;  %v1306_v34 = vpop.permute.xlu0 %1305  ;;  %v1352_v42 = vmul.f32 %v1348_v31, %v2333_v27  ;;  %v1353_v43 = vmul.f32 %v1349_v32, %v2338_v28 }
 0x3fc   : > { %v1310_v35 = vsel %vm1309_vm9, %v1306_v34, %v1308_v33  ;;  %v1311_v36 = vsel %vm1309_vm9, %v1308_v33, %v1306_v34 }
 0x3fd   : > { %v1312_v37 = vmul.f32 %v1311_v36, %v2333_v27  ;;  %v1313_v38 = vmul.f32 %v1310_v35, %v2338_v28  ;;  %v1356_v6 = vrot.slane %v1352_v42, 2  ;;  %v1357_v58 = vrot.slane %v1353_v43, 2 }
 0x3ff   : > { %v1365_v44 = vpop.permute.xlu1 %1364  ;;  %v1363_v45 = vpop.permute.xlu0 %1362  ;;  %v1337_v49 = vadd.f32 %v1333_v40, %v1312_v37  ;;  %v1338_v50 = vadd.f32 %v1334_v41, %v1313_v38 }
 0x400   : > { %v1367_v51 = vsel %vm1366_vm10, %v1363_v45, %v1365_v44  ;;  %v1368_v39 = vsel %vm1366_vm10, %v1365_v44, %v1363_v45 }
 0x401   : > { %v1371_v55 = vrot.slane %v1368_v39, 5  ;;  %v1372_v5 = vrot.slane %v1367_v51, 5  ;;  %v1360_v63 = vadd.f32 %v1356_v6, %v1337_v49  ;;  %v1361_v3 = vadd.f32 %v1357_v58, %v1338_v50  ;;  %v1303_v51 = vld [vmem:[%s2440_s3 + $0x10] sm:$0x1]  ;;  %v1304_v39 = vld [vmem:[%s2440_s3 + $0x18] sm:$0x1] }
 0x403   : > { %v1375_v59 = vmul.f32 %v1371_v55, %v2333_v27  ;;  %v1376_v4 = vmul.f32 %v1372_v5, %v2338_v28  ;;  %v1398_v60 = vpop.permute.xlu1 %1397  ;;  %v1396_v61 = vpop.permute.xlu0 %1395 }
 0x404   : > { %v1400_v7 = vsel %vm1399_vm11, %v1396_v61, %v1398_v60  ;;  %v1401_v10 = vsel %vm1399_vm11, %v1398_v60, %v1396_v61  ;;  %v1476_v60 = vstv %s1475_s8 }
 0x405   : > { %v1379_v11 = vrot.slane %v1375_v59, 3  ;;  %v1380_v12 = vrot.slane %v1376_v4, 3  ;;  %v1404_v13 = vrot.slane %v1400_v7, 3  ;;  %v1405_v14 = vrot.slane %v1401_v10, 3 }
 0x407   : > { %v1383_v15 = vadd.f32 %v1379_v11, %v1360_v63  ;;  %v1384_v8 = vadd.f32 %v1380_v12, %v1361_v3  ;;  %v1408_v9 = vmul.f32 %v1404_v13, %v2333_v27  ;;  %v1409_v17 = vmul.f32 %v1405_v14, %v2338_v28  ;;  %v1421_v18 = vpop.permute.xlu1 %1420  ;;  %v1419_v19 = vpop.permute.xlu0 %1418 }
 0x408   : > { %v1423_v16 = vsel %vm1422_vm12, %v1419_v19, %v1421_v18  ;;  %v1424_v20 = vsel %vm1422_vm12, %v1421_v18, %v1419_v19 }
 0x409   : > { %v1427_v23 = vrot.slane %v1423_v16, 2  ;;  %v1428_v24 = vrot.slane %v1424_v20, 2  ;;  %v1394_v25 = vadd.f32 %v1390_v21, %v1384_v8  ;;  %v1393_v26 = vadd.f32 %v1389_v22, %v1383_v15 }
 0x40a   : > { %v1412_v29 = vrot.slane %v1408_v9, 5  ;;  %v1413_v30 = vrot.slane %v1409_v17, 5 }
 0x40b   : > { %v1444_v31 = vpop.permute.xlu1 %1443  ;;  %v1442_v32 = vpop.permute.xlu0 %1441  ;;  %v1431_v33 = vmul.f32 %v1427_v23, %v2333_v27  ;;  %v1432_v34 = vmul.f32 %v1428_v24, %v2338_v28 }
 0x40c   : > { %v1446_v35 = vsel %vm1445_vm13, %v1442_v32, %v1444_v31  ;;  %v1447_v36 = vsel %vm1445_vm13, %v1444_v31, %v1442_v32  ;;  %v1416_v42 = vadd.f32 %v1412_v29, %v1393_v26  ;;  %v1417_v43 = vadd.f32 %v1413_v30, %v1394_v25 }
 0x40d   : > { %v1450_v37 = vrot.slane %v1446_v35, 1  ;;  %v1451_v38 = vrot.slane %v1447_v36, 1  ;;  %v1435_v40 = vrot.slane %v1431_v33, 6  ;;  %v1436_v41 = vrot.slane %v1432_v34, 6 }
 0x40f   : > { %v1454_v44 = vmul.f32 %v1450_v37, %v2333_v27  ;;  %v1455_v45 = vmul.f32 %v1451_v38, %v2338_v28  ;;  %v1467_v49 = vpop.permute.xlu1 %1466  ;;  %v1465_v50 = vpop.permute.xlu0 %1464  ;;  %v1439_v5 = vadd.f32 %v1435_v40, %v1416_v42  ;;  %v1440_v6 = vadd.f32 %v1436_v41, %v1417_v43 }
 0x410   : > { %v1469_v55 = vsel %vm1468_vm14, %v1465_v50, %v1467_v49  ;;  %v1470_v47 = vsel %vm1468_vm14, %v1467_v49, %v1465_v50 }
 0x411   : > { %v1458_v58 = vrot.slane %v1454_v44, 7  ;;  %v1459_v0 = vrot.slane %v1455_v45, 7  ;;  %v1471_v4 = vmul.f32 %v1469_v55, %v1303_v51  ;;  %v1472_v28 = vmul.f32 %v1470_v47, %v1304_v39 }
 0x413   : > { %v1462_v59 = vadd.f32 %v1458_v58, %v1439_v5  ;;  %v1463_v27 = vadd.f32 %v1459_v0, %v1440_v6 }
 0x415   : > { %v1473_v61 = vadd.f32 %v1471_v4, %v1462_v59  ;;  %v1474_v62 = vadd.f32 %v1472_v28, %v1463_v27 }
 0x417   : > { %v1477_v63 = vadd.f32 %v1476_v60, %v1473_v61  ;;  %v1478_v3 = vadd.f32 %v1476_v60, %v1474_v62 }
 0x419   : > { %v1612_v7 = vmul.f32 -1.442695, %v1477_v63  ;;  %v1613_v10 = vmul.f32 -1.442695, %v1478_v3 }
 0x41b   : > { %1878 = vpow2.f32 %v1612_v7 }
 0x41c   : > { %1880 = vpow2.f32 %v1613_v10 }
 0x425   : > { %v1879_v11 = vpop.eup %1878 }
 0x426   : > { %v1881_v12 = vpop.eup %1880  ;;  %v1485_v13 = vadd.f32 1.0, %v1879_v11 }
 0x427   : > { %v1486_v14 = vadd.f32 1.0, %v1881_v12 }
 0x428   : > { %1882 = vrcp.f32 %v1485_v13 }
 0x429   : > { %1884 = vrcp.f32 %v1486_v14 }
 0x432   : > { %v1883_v15 = vpop.eup %1882 }
 0x433   : > { %v1885_v8 = vpop.eup %1884  ;;  %v1494_v9 = vrot.slane %v1883_v15, %v2271_v46 }
 0x434   : > { %v1498_v17 = vrot.slane %v1885_v8, %v2271_v46 }
 0x435   : > { %v1499_v18 = vmul.f32 %v1494_v9, %v2281_v54  ;;  %v1501_v19 = vmul.f32 %v1494_v9, %v2275_v52  ;;  %v1503_v16 = vmul.f32 %v1494_v9, %v2287_v56  ;;  %v1505_v20 = vmul.f32 %v1494_v9, %v2299_v1 }
 0x436   : > { %v1500_v21 = vmul.f32 %v1498_v17, %v2284_v48  ;;  %v1502_v22 = vmul.f32 %v1498_v17, %v2278_v53  ;;  %v1504_v46 = vmul.f32 %v1498_v17, %v2290_v57  ;;  %v1506_v54 = vmul.f32 %v1498_v17, %v2302_v2 }
 0x437   : > { %1507 = vst [vmem:[%s243_s26] sm:$0xff] %v1499_v18  ;;  %1509 = vst [vmem:[%s243_s26 + $0x10] sm:$0xff] %v1501_v19 }
 0x438   : > { %1511 = vst [vmem:[%s243_s26 + $0x20] sm:$0xff] %v1503_v16  ;;  %1513 = vst [vmem:[%s243_s26 + $0x30] sm:$0xff] %v1505_v20 }
 0x439   : > { %1508 = vst [vmem:[%s243_s26 + $0x8] sm:$0xff] %v1500_v21  ;;  %1510 = vst [vmem:[%s243_s26 + $0x18] sm:$0xff] %v1502_v22 }
 0x43a   : > { %1512 = vst [vmem:[%s243_s26 + $0x28] sm:$0xff] %v1504_v46  ;;  %1514 = vst [vmem:[%s243_s26 + $0x38] sm:$0xff] %v1506_v54 }
 0x43b   : > { %1929 = shalt.err (!%p1926_p2)
}
 0x43c   : > { %s1930_s8 = scalar_lea.hbm %s2386_s4, 1024  ;;  %s1934_s12 = scalar_lea.hbm %s2442_s5, 2048 }
 0x43d   : > { %p1931_p4 = scmp.ne.s32.totalorder %s2386_s4, %s1930_s8  ;;  %p1935_p9 = scmp.lt.u32.totalorder %s2386_s4, %s2442_s5 }
 0x43e   : > { %p1936_p1 = scmp.lt.u32.totalorder %s1934_s12, %s1930_s8  ;;  %p1938_p6 = scmp.lt.u32.totalorder %s1930_s8, %s2386_s4 }
 0x43f   : > { %p1932_p5 = pnand %p1931_p4, %p2449_p11 }
 0x440   : > { %p1937_p3 = por %p1936_p1, %p1935_p9 }
 0x441   : > { %p1933_p7 = pneg %p1932_p5 }
 0x442   : > { %p1939_p12 = por %p1938_p6, %p1937_p3 }
 0x444   : > { %p1940_p13 = pnand %p1939_p12, %p1933_p7 }
 0x446   : > { %1943 = shalt.err (!%p1940_p13)
}
 0x447   : > { %s1999_s26 = smov 256  }
 0x448   : > { %1816 = dma.vmem_to_hbm [thread:$0]  (%p2449_p11), %s2392_s30, 1024, %s2386_s4, %s1516_s19, %s1999_s26, %s1999_s26, %s1990_s11  }
 0x449 PF: > { %s1544_s13 = sand.u32 1, %s1970_s20   ;;  %p2450_p8 = scmp.ne.s32.totalorder %s2447_s7, 0 }
 0x44a   : > { %p2451_p10 = scmp.ge.s32.totalorder %s1982_s23, 2  ;;  %s1545_s15 = scalar_lea.sflag [#allocation5], %s1544_s13 }
 0x44c   : > { %p1823_p0 = pnand %p2451_p10, %p2450_p8 }
 0x44e   : > { %1965 = dma.done.wait (!%p1823_p0), %s1545_s15, 1024  }
 0x44f   : > { %1967 = vsyncadd (!%p1823_p0), %s1545_s15, 4294966272  ;;  %p19_p2 = scmp.ge.s32.totalorder %s2058_s25, 4   ;;  %s2452_s20 = smov %s1974_s21 }
 0x450   : > { %s2453_s21 = smov %s1978_s22  ;;  %s2454_s22 = smov %s2070_s28 }
 0x451   : > { %s2455_s23 = smov %s2058_s25  ;;  %21 = sbr.rel (!%p19_p2) target bundleno = 7 (0x7), region = 85 }
 0x458   :  { %1550 = vsyncpa [#allocation4], 1 }
 0x459   :  { %1552 = vsyncpa [#allocation4 + $0x1], 1 }
 0x45a   :  { %1553 = vsyncpa [#allocation5], 1 }
 0x45b   :  { %1555 = vsyncpa [#allocation5 + $0x1], 1 }

</bundles_post_ra>
